<compile_context>
chip_gen: v7x
topology: tpu7x:2x2x1
jax: 0.10.0
libtpu: 0.0.40
codegen_flags: <defaults>
</compile_context>

<pallas_src>
import functools
import math

import jax
import jax.numpy as jnp
from jax import lax
from jax.experimental import pallas as pl
from jax.experimental.pallas import tpu as pltpu


# ------------------------------ Pallas kernel ------------------------------- #

def _block_y_kernel(xt_ref, mask_ref, w1_ref, b1_ref, w2_ref, b2_ref,
                    wr_ref, br_ref, we_ref, be_ref, w3_ref, b3_ref,
                    wp_ref, bp_ref, pool_ref, exp_ref, o_ref,
                    *, cin, has_proj, approx_recip):
    """Full BlockY forward for Nb batch elements, everything VMEM/vreg resident.

    Channel-major layout: activations are (channels, Nb*Mo) so the lane axis is dense.
    MXU operands use the compute dtype; accumulation and the epilogue stay f32.
    """
    cd = w1_ref.dtype
    x = xt_ref[0]                                                   # (9*Cin, Nb*Mo)

    # conv_1 (1x1 + BN + ReLU) for all 9 taps at once via the block-diagonal stacked W1,
    # then zero the contributions coming from the zero-padding of the input.
    y1 = jnp.dot(w1_ref[...], x, preferred_element_type=jnp.float32) + b1_ref[...]
    y1 = jnp.maximum(y1, 0.0) * mask_ref[...]                       # (9*Cb, Nb*Mo)

    # conv_2 (grouped 3x3, stride s) + BN + ReLU: the 9 taps are stacked along K = 9*Cb.
    y2 = jnp.dot(w2_ref[...], y1.astype(cd),
                 preferred_element_type=jnp.float32) + b2_ref[...]
    y2 = jnp.maximum(y2, 0.0)                                       # (Cb, Nb*Mo)

    # Squeeze-and-Excitation.  Per-image global average pool and per-image gate broadcast
    # are matmuls with constant pooling/expansion matrices (batch lives on the lane axis).
    pool = jnp.dot(y2.astype(cd), pool_ref[...],
                   preferred_element_type=jnp.float32)              # (Cb, Nb)
    se = jnp.dot(wr_ref[...], pool.astype(cd),
                 preferred_element_type=jnp.float32) + br_ref[...]  # (w_se, Nb)
    se = jnp.maximum(se, 0.0)
    se = jnp.dot(we_ref[...], se.astype(cd),
                 preferred_element_type=jnp.float32) + be_ref[...]  # (Cb, Nb)
    den = 1.0 + jnp.exp(-se)                                        # sigmoid
    se = pl.reciprocal(den, approx=True) if approx_recip else 1.0 / den
    gate = jnp.dot(se.astype(cd), exp_ref[...],
                   preferred_element_type=jnp.float32)              # (Cb, Nb*Mo)
    y2 = y2 * gate

    # Shortcut branch: the centre tap IS the stride-subsampled input.
    x_c = x[4 * cin:5 * cin, :]                                     # (Cin, Nb*Mo)
    if has_proj:
        x_inp = jnp.dot(wp_ref[...], x_c,
                        preferred_element_type=jnp.float32) + bp_ref[...]
    else:
        x_inp = x_c.astype(jnp.float32)                             # identity shortcut

    # conv_3 (1x1 + BN) + residual + final ReLU; lane-dense (Cout, Nb*Mo) store.
    z = jnp.dot(w3_ref[...], y2.astype(cd),
                preferred_element_type=jnp.float32) + b3_ref[...] + x_inp
    o_ref[0] = jnp.maximum(z, 0.0).astype(o_ref.dtype)


# ------------------------- one-time weight preparation ----------------------- #

def _fold_bn(gamma, beta, mean, var, eps=1e-5):
    scale = gamma / jnp.sqrt(var + eps)
    bias = beta - mean * scale
    return scale, bias


def prepare_block_y_params(p, *, stride, group_width, compute_dtype=jnp.bfloat16,
                           bn_eps=1e-5):
    """Fold eval-mode BN into the conv weights, build the tap-stacked matrices and cast
    MXU operands.  Call once; the result is reused across forward calls."""
    cb, cin = p["w1"].shape[:2]
    cout = p["w3"].shape[0]
    gw = group_width
    cd = compute_dtype

    s1, b1 = _fold_bn(*p["bn1"], eps=bn_eps)
    s2, b2 = _fold_bn(*p["bn2"], eps=bn_eps)
    s3, b3 = _fold_bn(*p["bn3"], eps=bn_eps)

    # conv_1 folded, stacked block-diagonally over the 9 taps: (9*Cb, 9*Cin)
    w1_t = p["w1"][:, :, 0, 0] * s1[:, None]                        # (Cb, Cin)
    w1_s = jnp.kron(jnp.eye(9, dtype=jnp.float32), w1_t)            # (9*Cb, 9*Cin)
    b1_s = jnp.tile(b1, 9).reshape(9 * cb, 1)

    # grouped 3x3 conv_2 -> per-tap block-diagonal dense (Cb, Cb), stacked along K = 9*Cb.
    w2 = jnp.transpose(p["w2"], (2, 3, 1, 0)).reshape(9, gw, cb)    # (tap, in-in-grp, out)
    gid = jnp.arange(cb) // gw
    grp_mask = (gid[:, None] == gid[None, :]).astype(jnp.float32)   # (Cb_in, Cb_out)
    w2_bd = w2[:, jnp.arange(cb) % gw, :] * grp_mask[None] * s2[None, None, :]
    w2_s = jnp.transpose(w2_bd, (2, 0, 1)).reshape(cb, 9 * cb)      # (Cb, 9*Cb)
    # NOTE(v5e): K = 9*Cb > 128 splits into two MXU passes on the 128-wide MXU; pad the
    # stacked K to a 128 boundary if Cb grows (single pass on v6e/v7x's 256-wide MXU).

    w3_t = p["w3"][:, :, 0, 0] * s3[:, None]                        # (Cout, Cb)

    has_proj = "wp" in p
    if has_proj:
        sp, bp = _fold_bn(*p["bnp"], eps=bn_eps)
        wp_t = p["wp"][:, :, 0, 0] * sp[:, None]                    # (Cout, Cin)
        bp_c = bp.reshape(cout, 1).astype(jnp.float32)
    else:
        assert cin == cout and stride == 1, (
            "identity shortcut requires in_channels == out_channels and stride == 1")
        wp_t = jnp.zeros((1, 1), jnp.float32)                       # unused dummies
        bp_c = jnp.zeros((1, 1), jnp.float32)

    return dict(
        stride=stride, has_proj=has_proj, compute_dtype=cd,
        cin=cin, cb=cb, cout=cout,
        w1=w1_s.astype(cd), b1=b1_s.astype(jnp.float32),
        w2=w2_s.astype(cd), b2=b2.reshape(cb, 1).astype(jnp.float32),
        w3=w3_t.astype(cd), b3=b3.reshape(cout, 1).astype(jnp.float32),
        wp=wp_t.astype(cd), bp=bp_c,
        wr=p["se_r_w"][:, :, 0, 0].astype(cd),
        br=p["se_r_b"].reshape(-1, 1).astype(jnp.float32),
        we=p["se_e_w"][:, :, 0, 0].astype(cd),
        be=p["se_e_b"].reshape(cb, 1).astype(jnp.float32),
    )


# ------------------------------- forward wrapper ------------------------------ #

def _const_spec(a):
    nd = a.ndim
    return pl.BlockSpec(a.shape, lambda s, _nd=nd: (0,) * _nd)


def block_y_forward(x_nchw, prep, *, batch_block=None):
    """Forward pass matching PyTorch BlockY (eval-mode BN).  Input/output NCHW."""
    stride = prep["stride"]
    cin, cb, cout = prep["cin"], prep["cb"], prep["cout"]
    cd = prep["compute_dtype"]
    n, cin_x, h, w = x_nchw.shape
    assert cin_x == cin
    ho = (h + 2 - 3) // stride + 1
    wo = (w + 2 - 3) // stride + 1
    mo = ho * wo

    # Batch elements per grid step: aim for a lane-dense (>= 128) Nb*Mo slab while keeping
    # the grid ("parallel") long enough for v7x's two TensorCores when N allows it.
    if batch_block is None:
        batch_block = max(1, min(n, -(-128 // mo)))
        while n % batch_block:
            batch_block -= 1
    nb = batch_block
    assert n % nb == 0
    steps = n // nb
    lanes = nb * mo

    x = jnp.transpose(x_nchw, (0, 2, 3, 1)).astype(jnp.float32)     # NHWC
    x_pad = jnp.pad(x, ((0, 0), (1, 1), (1, 1), (0, 0)))

    # 9 stride-subsampled taps of the zero-padded input + pad-validity mask.
    oy = jnp.arange(ho) * stride - 1
    ox = jnp.arange(wo) * stride - 1
    taps, masks = [], []
    for ky in range(3):
        rv = ((oy + ky) >= 0) & ((oy + ky) < h)
        for kx in range(3):
            cv = ((ox + kx) >= 0) & ((ox + kx) < w)
            taps.append(x_pad[:, ky:ky + (ho - 1) * stride + 1:stride,
                              kx:kx + (wo - 1) * stride + 1:stride, :])
            masks.append((rv[:, None] & cv[None, :]).astype(jnp.float32).reshape(mo))

    # channel-major tap slab: (steps, 9*Cin, Nb*Mo), lane index = nb*Mo + m
    xt = jnp.stack(taps, 0).reshape(9, n, mo, cin)
    xt = jnp.transpose(xt, (1, 0, 3, 2))                            # (N, 9, Cin, Mo)
    xt = xt.reshape(steps, nb, 9 * cin, mo)
    xt = jnp.transpose(xt, (0, 2, 1, 3)).reshape(steps, 9 * cin, lanes).astype(cd)

    mask9 = jnp.stack(masks, 0)                                     # (9, Mo)
    mask_full = jnp.tile(jnp.repeat(mask9, cb, axis=0), (1, nb))    # (9*Cb, Nb*Mo) f32

    # constant per-image pooling / gate-expansion matrices (batch lives on lanes)
    pool_mat = jnp.kron(jnp.eye(nb, dtype=jnp.float32),
                        jnp.full((mo, 1), 1.0 / mo, jnp.float32)).astype(cd)
    exp_mat = jnp.kron(jnp.eye(nb, dtype=jnp.float32),
                       jnp.ones((1, mo), jnp.float32)).astype(cd)

    kernel = functools.partial(
        _block_y_kernel, cin=cin, has_proj=prep["has_proj"],
        approx_recip=(jnp.dtype(cd) != jnp.dtype(jnp.float32)))

    out = pl.pallas_call(
        kernel,
        out_shape=jax.ShapeDtypeStruct((steps, cout, lanes), jnp.float32),
        grid=(steps,),
        in_specs=[
            pl.BlockSpec((1, 9 * cin, lanes), lambda s: (s, 0, 0)),  # per-step tap slab
            _const_spec(mask_full),
            _const_spec(prep["w1"]), _const_spec(prep["b1"]),
            _const_spec(prep["w2"]), _const_spec(prep["b2"]),
            _const_spec(prep["wr"]), _const_spec(prep["br"]),
            _const_spec(prep["we"]), _const_spec(prep["be"]),
            _const_spec(prep["w3"]), _const_spec(prep["b3"]),
            _const_spec(prep["wp"]), _const_spec(prep["bp"]),
            _const_spec(pool_mat), _const_spec(exp_mat),
        ],
        out_specs=pl.BlockSpec((1, cout, lanes), lambda s: (s, 0, 0)),
        compiler_params=pltpu.CompilerParams(
            dimension_semantics=("parallel",),
            vmem_limit_bytes=32 * 1024 * 1024),
    )(xt, mask_full, prep["w1"], prep["b1"], prep["w2"], prep["b2"],
      prep["wr"], prep["br"], prep["we"], prep["be"], prep["w3"], prep["b3"],
      prep["wp"], prep["bp"], pool_mat, exp_mat)

    out = out.reshape(steps, cout, nb, ho, wo)
    out = jnp.transpose(out, (0, 2, 1, 3, 4)).reshape(n, cout, ho, wo)   # NCHW
    return out


# ------------------------------ JAX reference -------------------------------- #

def block_y_reference(x_nchw, p, *, stride, groups):
    dn = ("NHWC", "HWIO", "NHWC")

    def bn(y, gamma, beta, mean, var, eps=1e-5):
        return (y - mean) / jnp.sqrt(var + eps) * gamma + beta

    x = jnp.transpose(x_nchw, (0, 2, 3, 1))
    w1_hwio = jnp.transpose(p["w1"], (2, 3, 1, 0))
    w2_hwio = jnp.transpose(p["w2"], (2, 3, 1, 0))
    w3_hwio = jnp.transpose(p["w3"], (2, 3, 1, 0))

    if "wp" in p:
        wp_hwio = jnp.transpose(p["wp"], (2, 3, 1, 0))
        xi = lax.conv_general_dilated(x, wp_hwio, (stride, stride), "VALID",
                                      dimension_numbers=dn)
        xi = bn(xi, *p["bnp"])
    else:
        xi = x

    y = lax.conv_general_dilated(x, w1_hwio, (1, 1), "VALID", dimension_numbers=dn)
    y = jax.nn.relu(bn(y, *p["bn1"]))
    y = lax.conv_general_dilated(y, w2_hwio, (stride, stride), ((1, 1), (1, 1)),
                                 dimension_numbers=dn, feature_group_count=groups)
    y = jax.nn.relu(bn(y, *p["bn2"]))

    se = jnp.mean(y, axis=(1, 2), keepdims=True)
    se = jax.nn.relu(jnp.einsum("nhwc,dc->nhwd", se, p["se_r_w"][:, :, 0, 0])
                     + p["se_r_b"])
    se = jax.nn.sigmoid(jnp.einsum("nhwc,dc->nhwd", se, p["se_e_w"][:, :, 0, 0])
                        + p["se_e_b"])
    y = y * se

    y = lax.conv_general_dilated(y, w3_hwio, (1, 1), "VALID", dimension_numbers=dn)
    y = bn(y, *p["bn3"])
    out = jax.nn.relu(xi + y)
    return jnp.transpose(out, (0, 3, 1, 2))


# ---------------------------------- main ------------------------------------- #

if __name__ == "__main__":
    # BlockY(in_channels=8, out_channels=16, stride=2, bottleneck_ratio=1.0,
    #        group_width=8, se_ratio=0.25)
    N, Cin, H, W = 4, 8, 16, 16
    Cout, stride, group_width, se_ratio = 16, 2, 8, 0.25
    Cb = int(round(Cout * 1.0))
    groups = Cb // group_width                   # = 2
    w_se = int(round(Cin * se_ratio))            # = 2

    key = jax.random.PRNGKey(0)
    ks = jax.random.split(key, 16)

    def conv_w(k, shape, fan_in):
        return jax.random.normal(k, shape, jnp.float32) * (1.0 / math.sqrt(fan_in))

    def bn_params(k, c):
        k1, k2, k3, k4 = jax.random.split(k, 4)
        gamma = 1.0 + 0.1 * jax.random.normal(k1, (c,), jnp.float32)
        beta = 0.1 * jax.random.normal(k2, (c,), jnp.float32)
        mean = 0.1 * jax.random.normal(k3, (c,), jnp.float32)
        var = jax.random.uniform(k4, (c,), jnp.float32, 0.5, 1.5)
        return (gamma, beta, mean, var)

    params = {
        "wp": conv_w(ks[0], (Cout, Cin, 1, 1), Cin),                    # project_conv
        "bnp": bn_params(ks[1], Cout),
        "w1": conv_w(ks[2], (Cb, Cin, 1, 1), Cin),                      # conv_1
        "bn1": bn_params(ks[3], Cb),
        "w2": conv_w(ks[4], (Cb, group_width, 3, 3), group_width * 9),  # conv_2 grouped 3x3
        "bn2": bn_params(ks[5], Cb),
        "w3": conv_w(ks[6], (Cout, Cb, 1, 1), Cb),                      # conv_3
        "bn3": bn_params(ks[7], Cout),
        "se_r_w": conv_w(ks[8], (w_se, Cb, 1, 1), Cb),                  # se_reduce (bias)
        "se_r_b": 0.1 * jax.random.normal(ks[9], (w_se,), jnp.float32),
        "se_e_w": conv_w(ks[10], (Cb, w_se, 1, 1), w_se),               # se_expand (bias)
        "se_e_b": 0.1 * jax.random.normal(ks[11], (Cb,), jnp.float32),
    }

    x = jax.random.normal(ks[12], (N, Cin, H, W), jnp.float32)
    ref = jax.block_until_ready(
        block_y_reference(x, params, stride=stride, groups=groups))

    # f32 MXU-operand path: exact check against the lax.conv reference
    prep_f32 = prepare_block_y_params(params, stride=stride, group_width=group_width,
                                      compute_dtype=jnp.float32)
    out = jax.block_until_ready(block_y_forward(x, prep_f32))
    assert out.shape == (N, Cout, H // stride, W // stride), out.shape
    err = float(jnp.max(jnp.abs(out - ref)))
    assert err < 1e-3, err

    # default bf16 MXU-operand path (f32 accumulation + f32 epilogue): looser tolerance
    prep_bf16 = prepare_block_y_params(params, stride=stride, group_width=group_width)
    out_bf16 = jax.block_until_ready(block_y_forward(x, prep_bf16))
    err_bf16 = float(jnp.max(jnp.abs(out_bf16 - ref)))
    assert err_bf16 < 2.5e-1, err_bf16

    print("KERNEL_OK")
</pallas_src>

<mosaic_0001>
module attributes {stable_mosaic.version = 11 : i64} {
  func.func @_block_y_kernel(%arg0: i32, %arg1: memref<1x72x128xf32, #tpu.memory_space<vmem>>, %arg2: memref<144x128xf32, #tpu.memory_space<vmem>>, %arg3: memref<144x72xf32, #tpu.memory_space<vmem>>, %arg4: memref<144x1xf32, #tpu.memory_space<vmem>>, %arg5: memref<16x144xf32, #tpu.memory_space<vmem>>, %arg6: memref<16x1xf32, #tpu.memory_space<vmem>>, %arg7: memref<2x16xf32, #tpu.memory_space<vmem>>, %arg8: memref<2x1xf32, #tpu.memory_space<vmem>>, %arg9: memref<16x2xf32, #tpu.memory_space<vmem>>, %arg10: memref<16x1xf32, #tpu.memory_space<vmem>>, %arg11: memref<16x16xf32, #tpu.memory_space<vmem>>, %arg12: memref<16x1xf32, #tpu.memory_space<vmem>>, %arg13: memref<16x8xf32, #tpu.memory_space<vmem>>, %arg14: memref<16x1xf32, #tpu.memory_space<vmem>>, %arg15: memref<128x2xf32, #tpu.memory_space<vmem>>, %arg16: memref<2x128xf32, #tpu.memory_space<vmem>>, %arg17: memref<1x16x128xf32, #tpu.memory_space<vmem>>) attributes {dimension_semantics = [#tpu.dimension_semantics<parallel>], iteration_bounds = array<i64: 2>, scalar_prefetch = 0 : i64, scratch_operands = 0 : i64, tpu.core_type = #tpu.core_type<tc>, window_params = [{transform_indices = @transform_0, window_bounds = array<i64: 1, 72, 128>}, {pipeline_mode = #tpu.pipeline_mode<synchronous>, transform_indices = @transform_1, window_bounds = array<i64: 144, 128>}, {pipeline_mode = #tpu.pipeline_mode<synchronous>, transform_indices = @transform_2, window_bounds = array<i64: 144, 72>}, {pipeline_mode = #tpu.pipeline_mode<synchronous>, transform_indices = @transform_3, window_bounds = array<i64: 144, 1>}, {pipeline_mode = #tpu.pipeline_mode<synchronous>, transform_indices = @transform_4, window_bounds = array<i64: 16, 144>}, {pipeline_mode = #tpu.pipeline_mode<synchronous>, transform_indices = @transform_5, window_bounds = array<i64: 16, 1>}, {pipeline_mode = #tpu.pipeline_mode<synchronous>, transform_indices = @transform_6, window_bounds = array<i64: 2, 16>}, {pipeline_mode = #tpu.pipeline_mode<synchronous>, transform_indices = @transform_7, window_bounds = array<i64: 2, 1>}, {pipeline_mode = #tpu.pipeline_mode<synchronous>, transform_indices = @transform_8, window_bounds = array<i64: 16, 2>}, {pipeline_mode = #tpu.pipeline_mode<synchronous>, transform_indices = @transform_9, window_bounds = array<i64: 16, 1>}, {pipeline_mode = #tpu.pipeline_mode<synchronous>, transform_indices = @transform_10, window_bounds = array<i64: 16, 16>}, {pipeline_mode = #tpu.pipeline_mode<synchronous>, transform_indices = @transform_11, window_bounds = array<i64: 16, 1>}, {pipeline_mode = #tpu.pipeline_mode<synchronous>, transform_indices = @transform_12, window_bounds = array<i64: 16, 8>}, {pipeline_mode = #tpu.pipeline_mode<synchronous>, transform_indices = @transform_13, window_bounds = array<i64: 16, 1>}, {pipeline_mode = #tpu.pipeline_mode<synchronous>, transform_indices = @transform_14, window_bounds = array<i64: 128, 2>}, {pipeline_mode = #tpu.pipeline_mode<synchronous>, transform_indices = @transform_15, window_bounds = array<i64: 2, 128>}, {transform_indices = @transform_16, window_bounds = array<i64: 1, 16, 128>}]} {
    %c0 = arith.constant 0 : index
    %c0_0 = arith.constant 0 : index
    %c0_1 = arith.constant 0 : index
    %0 = vector.load %arg1[%c0, %c0_0, %c0_1] : memref<1x72x128xf32, #tpu.memory_space<vmem>>, vector<1x72x128xf32>
    %1 = vector.shape_cast %0 : vector<1x72x128xf32> to vector<72x128xf32>
    %c0_2 = arith.constant 0 : index
    %c0_3 = arith.constant 0 : index
    %2 = vector.load %arg3[%c0_2, %c0_3] : memref<144x72xf32, #tpu.memory_space<vmem>>, vector<144x72xf32>
    %cst = arith.constant dense<0.000000e+00> : vector<144x128xf32>
    %3 = tpu.matmul %2, %1, %cst {dimension_numbers = #tpu.dot_dimension_numbers<[1], [0], [0], [1], [0, 0, 1, 1], [], []>} : vector<144x72xf32>, vector<72x128xf32>, vector<144x128xf32> -> vector<144x128xf32>
    %c0_4 = arith.constant 0 : index
    %c0_5 = arith.constant 0 : index
    %4 = vector.load %arg4[%c0_4, %c0_5] : memref<144x1xf32, #tpu.memory_space<vmem>>, vector<144x1xf32>
    %5 = vector.broadcast %4 : vector<144x1xf32> to vector<144x128xf32>
    %6 = arith.addf %3, %5 : vector<144x128xf32>
    %cst_6 = arith.constant 0.000000e+00 : f32
    %7 = vector.broadcast %cst_6 : f32 to vector<144x128xf32>
    %8 = arith.maximumf %6, %7 : vector<144x128xf32>
    %c0_7 = arith.constant 0 : index
    %c0_8 = arith.constant 0 : index
    %9 = vector.load %arg2[%c0_7, %c0_8] : memref<144x128xf32, #tpu.memory_space<vmem>>, vector<144x128xf32>
    %10 = arith.mulf %8, %9 : vector<144x128xf32>
    %c0_9 = arith.constant 0 : index
    %c0_10 = arith.constant 0 : index
    %11 = vector.load %arg5[%c0_9, %c0_10] : memref<16x144xf32, #tpu.memory_space<vmem>>, vector<16x144xf32>
    %cst_11 = arith.constant dense<0.000000e+00> : vector<16x128xf32>
    %12 = tpu.matmul %11, %10, %cst_11 {dimension_numbers = #tpu.dot_dimension_numbers<[1], [0], [0], [1], [0, 0, 1, 1], [], []>} : vector<16x144xf32>, vector<144x128xf32>, vector<16x128xf32> -> vector<16x128xf32>
    %c0_12 = arith.constant 0 : index
    %c0_13 = arith.constant 0 : index
    %13 = vector.load %arg6[%c0_12, %c0_13] : memref<16x1xf32, #tpu.memory_space<vmem>>, vector<16x1xf32>
    %14 = vector.broadcast %13 : vector<16x1xf32> to vector<16x128xf32>
    %15 = arith.addf %12, %14 : vector<16x128xf32>
    %cst_14 = arith.constant 0.000000e+00 : f32
    %16 = vector.broadcast %cst_14 : f32 to vector<16x128xf32>
    %17 = arith.maximumf %15, %16 : vector<16x128xf32>
    %c0_15 = arith.constant 0 : index
    %c0_16 = arith.constant 0 : index
    %18 = vector.load %arg15[%c0_15, %c0_16] : memref<128x2xf32, #tpu.memory_space<vmem>>, vector<128x2xf32>
    %cst_17 = arith.constant dense<0.000000e+00> : vector<16x2xf32>
    %19 = tpu.matmul %17, %18, %cst_17 {dimension_numbers = #tpu.dot_dimension_numbers<[1], [0], [0], [1], [0, 0, 1, 1], [], []>} : vector<16x128xf32>, vector<128x2xf32>, vector<16x2xf32> -> vector<16x2xf32>
    %c0_18 = arith.constant 0 : index
    %c0_19 = arith.constant 0 : index
    %20 = vector.load %arg7[%c0_18, %c0_19] : memref<2x16xf32, #tpu.memory_space<vmem>>, vector<2x16xf32>
    %cst_20 = arith.constant dense<0.000000e+00> : vector<2x2xf32>
    %21 = tpu.matmul %20, %19, %cst_20 {dimension_numbers = #tpu.dot_dimension_numbers<[1], [0], [0], [1], [0, 0, 1, 1], [], []>} : vector<2x16xf32>, vector<16x2xf32>, vector<2x2xf32> -> vector<2x2xf32>
    %c0_21 = arith.constant 0 : index
    %c0_22 = arith.constant 0 : index
    %22 = vector.load %arg8[%c0_21, %c0_22] : memref<2x1xf32, #tpu.memory_space<vmem>>, vector<2x1xf32>
    %23 = vector.broadcast %22 : vector<2x1xf32> to vector<2x2xf32>
    %24 = arith.addf %21, %23 : vector<2x2xf32>
    %cst_23 = arith.constant 0.000000e+00 : f32
    %25 = vector.broadcast %cst_23 : f32 to vector<2x2xf32>
    %26 = arith.maximumf %24, %25 : vector<2x2xf32>
    %c0_24 = arith.constant 0 : index
    %c0_25 = arith.constant 0 : index
    %27 = vector.load %arg9[%c0_24, %c0_25] : memref<16x2xf32, #tpu.memory_space<vmem>>, vector<16x2xf32>
    %cst_26 = arith.constant dense<0.000000e+00> : vector<16x2xf32>
    %28 = tpu.matmul %27, %26, %cst_26 {dimension_numbers = #tpu.dot_dimension_numbers<[1], [0], [0], [1], [0, 0, 1, 1], [], []>} : vector<16x2xf32>, vector<2x2xf32>, vector<16x2xf32> -> vector<16x2xf32>
    %c0_27 = arith.constant 0 : index
    %c0_28 = arith.constant 0 : index
    %29 = vector.load %arg10[%c0_27, %c0_28] : memref<16x1xf32, #tpu.memory_space<vmem>>, vector<16x1xf32>
    %30 = vector.broadcast %29 : vector<16x1xf32> to vector<16x2xf32>
    %31 = arith.addf %28, %30 : vector<16x2xf32>
    %cst_29 = arith.constant 0.000000e+00 : f32
    %32 = vector.broadcast %cst_29 : f32 to vector<16x2xf32>
    %33 = arith.subf %32, %31 : vector<16x2xf32>
    %34 = math.exp %33 : vector<16x2xf32>
    %cst_30 = arith.constant 1.000000e+00 : f32
    %35 = vector.broadcast %cst_30 : f32 to vector<16x2xf32>
    %36 = arith.addf %35, %34 : vector<16x2xf32>
    %cst_31 = arith.constant 1.000000e+00 : f32
    %37 = vector.broadcast %cst_31 : f32 to vector<16x2xf32>
    %38 = arith.divf %37, %36 : vector<16x2xf32>
    %c0_32 = arith.constant 0 : index
    %c0_33 = arith.constant 0 : index
    %39 = vector.load %arg16[%c0_32, %c0_33] : memref<2x128xf32, #tpu.memory_space<vmem>>, vector<2x128xf32>
    %cst_34 = arith.constant dense<0.000000e+00> : vector<16x128xf32>
    %40 = tpu.matmul %38, %39, %cst_34 {dimension_numbers = #tpu.dot_dimension_numbers<[1], [0], [0], [1], [0, 0, 1, 1], [], []>} : vector<16x2xf32>, vector<2x128xf32>, vector<16x128xf32> -> vector<16x128xf32>
    %41 = arith.mulf %17, %40 : vector<16x128xf32>
    %42 = vector.extract_strided_slice %1 {offsets = [32, 0], sizes = [8, 128], strides = [1, 1]} : vector<72x128xf32> to vector<8x128xf32>
    %c0_35 = arith.constant 0 : index
    %c0_36 = arith.constant 0 : index
    %43 = vector.load %arg13[%c0_35, %c0_36] : memref<16x8xf32, #tpu.memory_space<vmem>>, vector<16x8xf32>
    %cst_37 = arith.constant dense<0.000000e+00> : vector<16x128xf32>
    %44 = tpu.matmul %43, %42, %cst_37 {dimension_numbers = #tpu.dot_dimension_numbers<[1], [0], [0], [1], [0, 0, 1, 1], [], []>} : vector<16x8xf32>, vector<8x128xf32>, vector<16x128xf32> -> vector<16x128xf32>
    %c0_38 = arith.constant 0 : index
    %c0_39 = arith.constant 0 : index
    %45 = vector.load %arg14[%c0_38, %c0_39] : memref<16x1xf32, #tpu.memory_space<vmem>>, vector<16x1xf32>
    %46 = vector.broadcast %45 : vector<16x1xf32> to vector<16x128xf32>
    %47 = arith.addf %44, %46 : vector<16x128xf32>
    %c0_40 = arith.constant 0 : index
    %c0_41 = arith.constant 0 : index
    %48 = vector.load %arg11[%c0_40, %c0_41] : memref<16x16xf32, #tpu.memory_space<vmem>>, vector<16x16xf32>
    %cst_42 = arith.constant dense<0.000000e+00> : vector<16x128xf32>
    %49 = tpu.matmul %48, %41, %cst_42 {dimension_numbers = #tpu.dot_dimension_numbers<[1], [0], [0], [1], [0, 0, 1, 1], [], []>} : vector<16x16xf32>, vector<16x128xf32>, vector<16x128xf32> -> vector<16x128xf32>
    %c0_43 = arith.constant 0 : index
    %c0_44 = arith.constant 0 : index
    %50 = vector.load %arg12[%c0_43, %c0_44] : memref<16x1xf32, #tpu.memory_space<vmem>>, vector<16x1xf32>
    %51 = vector.broadcast %50 : vector<16x1xf32> to vector<16x128xf32>
    %52 = arith.addf %49, %51 : vector<16x128xf32>
    %53 = arith.addf %52, %47 : vector<16x128xf32>
    %cst_45 = arith.constant 0.000000e+00 : f32
    %54 = vector.broadcast %cst_45 : f32 to vector<16x128xf32>
    %55 = arith.maximumf %53, %54 : vector<16x128xf32>
    %c0_46 = arith.constant 0 : index
    %c0_47 = arith.constant 0 : index
    %c0_48 = arith.constant 0 : index
    %56 = vector.load %arg17[%c0_46, %c0_47, %c0_48] : memref<1x16x128xf32, #tpu.memory_space<vmem>>, vector<1x16x128xf32>
    %57 = vector.shape_cast %56 : vector<1x16x128xf32> to vector<16x128xf32>
    %58 = vector.shape_cast %55 : vector<16x128xf32> to vector<1x16x128xf32>
    tpu.vector_store %arg17[%c0_46, %c0_47, %c0_48], %58 {strides = array<i32>} : memref<1x16x128xf32, #tpu.memory_space<vmem>>, vector<1x16x128xf32>,
    return
  }
  func.func @transform_0(%arg0: i32) -> (i32, i32, i32) {
    %c0_i32 = arith.constant 0 : i32
    %c0_i32_0 = arith.constant 0 : i32
    %c0_i32_1 = arith.constant 0 : i32
    return %arg0, %c0_i32, %c0_i32_0 : i32, i32, i32
  }
  func.func @transform_1(%arg0: i32) -> (i32, i32) {
    %c0_i32 = arith.constant 0 : i32
    %c0_i32_0 = arith.constant 0 : i32
    %c0_i32_1 = arith.constant 0 : i32
    return %c0_i32, %c0_i32_0 : i32, i32
  }
  func.func @transform_2(%arg0: i32) -> (i32, i32) {
    %c0_i32 = arith.constant 0 : i32
    %c0_i32_0 = arith.constant 0 : i32
    %c0_i32_1 = arith.constant 0 : i32
    return %c0_i32, %c0_i32_0 : i32, i32
  }
  func.func @transform_3(%arg0: i32) -> (i32, i32) {
    %c0_i32 = arith.constant 0 : i32
    %c0_i32_0 = arith.constant 0 : i32
    %c0_i32_1 = arith.constant 0 : i32
    return %c0_i32, %c0_i32_0 : i32, i32
  }
  func.func @transform_4(%arg0: i32) -> (i32, i32) {
    %c0_i32 = arith.constant 0 : i32
    %c0_i32_0 = arith.constant 0 : i32
    %c0_i32_1 = arith.constant 0 : i32
    return %c0_i32, %c0_i32_0 : i32, i32
  }
  func.func @transform_5(%arg0: i32) -> (i32, i32) {
    %c0_i32 = arith.constant 0 : i32
    %c0_i32_0 = arith.constant 0 : i32
    %c0_i32_1 = arith.constant 0 : i32
    return %c0_i32, %c0_i32_0 : i32, i32
  }
  func.func @transform_6(%arg0: i32) -> (i32, i32) {
    %c0_i32 = arith.constant 0 : i32
    %c0_i32_0 = arith.constant 0 : i32
    %c0_i32_1 = arith.constant 0 : i32
    return %c0_i32, %c0_i32_0 : i32, i32
  }
  func.func @transform_7(%arg0: i32) -> (i32, i32) {
    %c0_i32 = arith.constant 0 : i32
    %c0_i32_0 = arith.constant 0 : i32
    %c0_i32_1 = arith.constant 0 : i32
    return %c0_i32, %c0_i32_0 : i32, i32
  }
  func.func @transform_8(%arg0: i32) -> (i32, i32) {
    %c0_i32 = arith.constant 0 : i32
    %c0_i32_0 = arith.constant 0 : i32
    %c0_i32_1 = arith.constant 0 : i32
    return %c0_i32, %c0_i32_0 : i32, i32
  }
  func.func @transform_9(%arg0: i32) -> (i32, i32) {
    %c0_i32 = arith.constant 0 : i32
    %c0_i32_0 = arith.constant 0 : i32
    %c0_i32_1 = arith.constant 0 : i32
    return %c0_i32, %c0_i32_0 : i32, i32
  }
  func.func @transform_10(%arg0: i32) -> (i32, i32) {
    %c0_i32 = arith.constant 0 : i32
    %c0_i32_0 = arith.constant 0 : i32
    %c0_i32_1 = arith.constant 0 : i32
    return %c0_i32, %c0_i32_0 : i32, i32
  }
  func.func @transform_11(%arg0: i32) -> (i32, i32) {
    %c0_i32 = arith.constant 0 : i32
    %c0_i32_0 = arith.constant 0 : i32
    %c0_i32_1 = arith.constant 0 : i32
    return %c0_i32, %c0_i32_0 : i32, i32
  }
  func.func @transform_12(%arg0: i32) -> (i32, i32) {
    %c0_i32 = arith.constant 0 : i32
    %c0_i32_0 = arith.constant 0 : i32
    %c0_i32_1 = arith.constant 0 : i32
    return %c0_i32, %c0_i32_0 : i32, i32
  }
  func.func @transform_13(%arg0: i32) -> (i32, i32) {
    %c0_i32 = arith.constant 0 : i32
    %c0_i32_0 = arith.constant 0 : i32
    %c0_i32_1 = arith.constant 0 : i32
    return %c0_i32, %c0_i32_0 : i32, i32
  }
  func.func @transform_14(%arg0: i32) -> (i32, i32) {
    %c0_i32 = arith.constant 0 : i32
    %c0_i32_0 = arith.constant 0 : i32
    %c0_i32_1 = arith.constant 0 : i32
    return %c0_i32, %c0_i32_0 : i32, i32
  }
  func.func @transform_15(%arg0: i32) -> (i32, i32) {
    %c0_i32 = arith.constant 0 : i32
    %c0_i32_0 = arith.constant 0 : i32
    %c0_i32_1 = arith.constant 0 : i32
    return %c0_i32, %c0_i32_0 : i32, i32
  }
  func.func @transform_16(%arg0: i32) -> (i32, i32, i32) {
    %c0_i32 = arith.constant 0 : i32
    %c0_i32_0 = arith.constant 0 : i32
    %c0_i32_1 = arith.constant 0 : i32
    return %arg0, %c0_i32, %c0_i32_0 : i32, i32, i32
  }
}

</mosaic_0001>

<bundles_post_ra>
// kernel: tpu_custom_call.1
= control target key start
LH: loop header
LB: loop body
LE: loop exit
PB: predicated region body
PF: predicated region fallthrough
CT: control target
= control target key end

     0   :  { %s2662_s0 = inlined_call_operand.vmem [shape: f32[2,72,128], index: 0, kind: input, shape index: {}]   ;;  %s2663_s1 = inlined_call_operand.vmem [shape: f32[144,128], index: 1, kind: input, shape index: {}]   ;;  %s2664_s2 = inlined_call_operand.hbm [shape: f32[144,72], index: 2, kind: input, shape index: {}]   ;;  %s2665_s3 = inlined_call_operand.vmem [shape: f32[144,1], index: 3, kind: input, shape index: {}]   ;;  %s2666_s4 = inlined_call_operand.vmem [shape: f32[16,144], index: 4, kind: input, shape index: {}]   ;;  %s2667_s5 = inlined_call_operand.vmem [shape: f32[16,1], index: 5, kind: input, shape index: {}]   ;;  %s2668_s6 = inlined_call_operand.vmem [shape: f32[2,16], index: 6, kind: input, shape index: {}]   ;;  %s2669_s7 = inlined_call_operand.vmem [shape: f32[2,1], index: 7, kind: input, shape index: {}]   ;;  %s2670_s8 = inlined_call_operand.vmem [shape: f32[16,2], index: 8, kind: input, shape index: {}]   ;;  %s2671_s9 = inlined_call_operand.vmem [shape: f32[16,1], index: 9, kind: input, shape index: {}]   ;;  %s2672_s10 = inlined_call_operand.vmem [shape: f32[16,16], index: 10, kind: input, shape index: {}]   ;;  %s2673_s11 = inlined_call_operand.vmem [shape: f32[16,1], index: 11, kind: input, shape index: {}]   ;;  %s2674_s12 = inlined_call_operand.vmem [shape: f32[16,8], index: 12, kind: input, shape index: {}]   ;;  %s2675_s13 = inlined_call_operand.vmem [shape: f32[16,1], index: 13, kind: input, shape index: {}]   ;;  %s2676_s14 = inlined_call_operand.vmem [shape: f32[128,2], index: 14, kind: input, shape index: {}]   ;;  %s2677_s15 = inlined_call_operand.vmem [shape: f32[2,128], index: 15, kind: input, shape index: {}]   ;;  %s2678_s16 = inlined_call_operand.hbm [shape: f32[2,16,128], index: 16, kind: output, shape index: {}]  }
   0x1   :  { %2687 = sst [smem:[#allocation13_spill]] %s2662_s0 }
   0x2   :  { %21 = vsyncpa [#allocation3], 0 }
   0x3   :  { %22 = vsyncpa [#allocation4], 0 }
   0x4   :  { %24 = vsyncpa [#allocation4 + $0x1], 0  ;;  %s2253_s21 = smov 0   ;;  %s2255_s22 = smov 0  }
   0x5   :  { %s2257_s23 = smov 0   ;;  %s2259_s24 = smov 0  }
   0x6 LB: > { %2688 = sst [smem:[#allocation8_spill]] %s2144_s21  ;;  %s2274_s25 = sadd.s32 4294967295, %s2156_s24   ;;  %s2156_s24 = sphi %s2259_s24, %s2705_s24   ;;  %s2152_s23 = sphi %s2257_s23, %s2707_s23   ;;  %s2148_s22 = sphi %s2255_s22, %s2709_s22   ;;  %s2144_s21 = sphi %s2253_s21, %s2708_s21  }
   0x7   : > { %2689 = sst [smem:[#allocation9_spill]] %s2152_s23  ;;  %s1690_s26 = sadd.s32 4294967294, %s2156_s24  }
   0x8   : > { %s2278_s27 = sadd.s32 1, %s2156_s24   ;;  %s378_s28 = sadd.s32 1, %s2152_s23 }
   0x9   : > { %2690 = sst [smem:[#allocation10_spill]] %s2278_s27  ;;  %s375_s29 = ssub.s32 %s2156_s24, %s2278_s27 }
   0xa   : > { %p388_p0 = scmp.ne.s32.totalorder %s2152_s23, %s2148_s22  ;;  %p376_p1 = scmp.eq.s32.totalorder %s375_s29, 0 }
   0xb   : > { %p389_p2 = scmp.eq.s32.totalorder %s2274_s25, 1  ;;  %p394_p3 = scmp.ne.s32.totalorder %s2148_s22, %s2144_s21 }
   0xc   : > { %p395_p4 = scmp.eq.s32.totalorder %s1690_s26, 1  ;;  %p1691_p7 = scmp.ge.s32.totalorder %s2156_s24, 1 }
   0xd   : > { %s2289_s30 = scalar_select %p376_p1, %s2152_s23, %s378_s28  }
   0xe   : > { %p2291_p5 = por %p389_p2, %p388_p0  ;;  %p2295_p6 = por %p395_p4, %p394_p3 }
   0xf   : > { %2691 = sst [smem:[#allocation11_spill]] %s2289_s30  ;;  %p402_p8 = scmp.lt.s32.totalorder %s2156_s24, 3 }
  0x10   : > { %s2692_s0 = scalar_select %p2291_p5, 1, 0 }
  0x11   : > { %s2693_s17 = scalar_select %p2295_p6, 1, 0 }
  0x12   : > { %p2684_p9 = scmp.eq.s32.totalorder %s2274_s25, 0  ;;  %p2302_p10 = pnand %p1691_p7, %p402_p8 }
  0x13   : > { %2694 = sst [smem:[#allocation12_spill]] %s2693_s17  ;;  %s2158_s19 = smov [#allocation2]  }
  0x14   : > { %s2695_s18 = scalar_select %p2302_p10, 1, 0 }
  0x15   : > { %s417_s20 = sshll.u32 %s2158_s19, 4  ;;  %p2000_p11 = pneg %p2302_p10  ;;  %s418_s20 = int_to_ptr.vmem [resolvable:$true] %s417_s20 }
  0x16   : > { %s2062_s30 = scalar_lea.hbm %s2664_s2, 2304 }
  0x17   : > { %p2310_p12 = pnand %p2684_p9, %p2000_p11  ;;  %p2063_p13 = scmp.ne.s32.totalorder %s2664_s2, %s2062_s30 }
  0x18   : > { %p2069_p3 = scmp.lt.u32.totalorder %s2062_s30, %s2664_s2 }
  0x19   : > { %p2064_p0 = pneg %p2310_p12 }
  0x1b   : > { %p2065_p1 = pnand %p2064_p0, %p2063_p13 }
  0x1d   : > { %p2066_p2 = pneg %p2065_p1 }
  0x1f   : > { %p2071_p4 = pnand %p2069_p3, %p2066_p2 }
  0x21   : > { %2074 = shalt.err (!%p2071_p4)
}
  0x22   : > { %s2075_s21 = scalar_lea.vmem %s418_s20, 2304  ;;  %p2083_p9 = scmp.lt.s32.totalorder %s418_s20, %s418_s20 }
  0x23   : > { %p2076_p7 = scmp.ne.s32.totalorder %s418_s20, %s2075_s21  ;;  %p2084_p6 = scmp.lt.s32.totalorder %s2075_s21, %s2075_s21 }
  0x25   : > { %p2078_p8 = pnand %p2076_p7, %p2064_p0  ;;  %p2085_p5 = por %p2084_p6, %p2083_p9 }
  0x27   : > { %p2079_p11 = pneg %p2078_p8 }
  0x29   : > { %p2086_p10 = pnand %p2085_p5, %p2079_p11 }
  0x2b   : > { %2089 = shalt.err (!%p2086_p10)
}
  0x2c   : > { %s2159_s23 = smov 128   ;;  %s2160_s27 = smov 8  }
  0x2d   : > { %2003 = dma.hbm_to_vmem [thread:$0]  (!%p2310_p12), %s2664_s2, 2304, %s418_s20, [#allocation3], %s2159_s23, %s2159_s23, %s2160_s27  }
  0x2e   : > { %p2697_p13 = scmp.ne.s32.totalorder %s2695_s18, 0 }
  0x2f   : > { %p2698_p1 = scmp.eq.s32.totalorder (!%p2697_p13), %s2274_s25, 0 }
  0x30   : > { %480 = sbr.rel (%p2697_p13) target bundleno = 1693 (0x69d), region = 84 }
  0x37   : > { %2135 = dma.done.wait (%p2698_p1), [#allocation3], 2304   ;;  %p2699_p0 = pmov %p2698_p1 }
  0x38   : > { %p530_p5 = scmp.lt.s32.totalorder %s2274_s25, 1  ;;  %v2161_v0 = vmov 0   ;;  %s2700_s20 = sld [smem:[#allocation13_spill]]  ;;  %vm670_vm0 = vcmask 588800   ;;  %v544_v9 = vld [vmem:[#allocation2] sm:$0xff]  ;;  %v564_v15 = vld [vmem:[%s2665_s3 + $0x10] sm:$0xff] }
  0x39   : > { %2137 = vsyncadd (%p2699_p0), [#allocation3], 4294964992  ;;  %2052 = vset.pattern.permute.xlu0 %v2161_v0  ;;  %2053 = vset.pattern.permute.xlu1 %v2161_v0  ;;  %v562_v13 = vld [vmem:[%s2665_s3] sm:$0xff]  ;;  %v563_v16 = vld [vmem:[%s2665_s3 + $0x8] sm:$0xff]  ;;  %v2162_v59 = vmov 0.0|0.0   ;;  %vm950_vm1 = vcmask 130048  }
  0x3a   : > { %s531_s21 = scalar_select %p530_p5, %s2274_s25, 1  ;;  %1814 = vmatprep.mubr.msk.f32.mxu0 %vm670_vm0, %v544_v9  ;;  %582 = vperm.xlu0 %2052, %v562_v13   ;;  %v565_v17 = vld [vmem:[%s2665_s3 + $0x18] sm:$0xff]  ;;  %v566_v19 = vld [vmem:[%s2665_s3 + $0x20] sm:$0xff]  ;;  %v567_v20 = vld [vmem:[%s2665_s3 + $0x28] sm:$0xff]  ;;  %vm2163_vm2 = vmmov 0   ;;  %vm1220_vm3 = vcmask 15360  }
  0x3b   : > { %592 = vperm.xlu1 %2053, %v564_v15   ;;  %v545_v21 = vld [vmem:[#allocation2 + $0x8] sm:$0xff]  ;;  %v568_v22 = vld [vmem:[%s2665_s3 + $0x30] sm:$0xff]  ;;  %v569_v24 = vld [vmem:[%s2665_s3 + $0x38] sm:$0xff]  ;;  %1921 = vmatprep.subr.bf16.mxu1 %v2162_v59  ;;  %vm1227_vm4 = vcmask 1041408   ;;  %vm1419_vm5 = vcmask 64512   ;;  %s1734_s17 = sshll.u32 %s2274_s25, 8 }
  0x3c   : > { %s1993_s30 = smul.u32 72, %s531_s21  ;;  %v546_v23 = vld [vmem:[#allocation2 + $0x10] sm:$0xff]  ;;  %v547_v25 = vld [vmem:[#allocation2 + $0x18] sm:$0xff]  ;;  %v570_v26 = vld [vmem:[%s2665_s3 + $0x40] sm:$0xff]  ;;  %s2619_s18 = scalar_lea.hbm %s2678_s16, %s1734_s17 }
  0x3d   : > { %v548_v27 = vld [vmem:[#allocation2 + $0x20] sm:$0xff]  ;;  %v571_v28 = vld [vmem:[%s2665_s3 + $0x48] sm:$0xff]  ;;  %v572_v30 = vld [vmem:[%s2665_s3 + $0x50] sm:$0xff]  ;;  %p2701_p9 = scmp.ne.s32.totalorder %s2692_s0, 0  ;;  %s2165_s27 = smov [#allocation5]  }
  0x3e   : > { %s534_s19 = scalar_lea.vmem %s2700_s20, %s1993_s30  ;;  %587 = vperm.xlu0 %2052, %v563_v16   ;;  %v549_v29 = vld [vmem:[#allocation2 + $0x28] sm:$0xff]  ;;  %v550_v31 = vld [vmem:[#allocation2 + $0x30] sm:$0xff]  ;;  %v573_v32 = vld [vmem:[%s2665_s3 + $0x58] sm:$0xff]  ;;  %s2094_s28 = sshll.u32 %s2165_s27, 4  ;;  %s2095_s28 = int_to_ptr.vmem [resolvable:$false] %s2094_s28 }
  0x3f   : > { %v535_v1 = vld [vmem:[%s534_s19] sm:$0xff]  ;;  %v536_v2 = vld [vmem:[%s534_s19 + $0x8] sm:$0xff]  ;;  %v537_v3 = vld [vmem:[%s534_s19 + $0x10] sm:$0xff]  ;;  %597 = vperm.xlu1 %2053, %v565_v17  }
  0x40   : > { %v1905_v4 = vpack.c.bf16 %v536_v2, %v535_v1  ;;  %v538_v5 = vld [vmem:[%s534_s19 + $0x18] sm:$0xff]  ;;  %v2341_v7 = vld [vmem:[%s534_s19 + $0x20] sm:$0xff]  ;;  %v540_v8 = vld [vmem:[%s534_s19 + $0x28] sm:$0xff] }
  0x41   : > { %v1909_v6 = vpack.c.bf16 %v538_v5, %v537_v3  ;;  %v1913_v10 = vpack.c.bf16 %v540_v8, %v2341_v7  ;;  %v541_v11 = vld [vmem:[%s534_s19 + $0x30] sm:$0xff]  ;;  %v542_v12 = vld [vmem:[%s534_s19 + $0x38] sm:$0xff]  ;;  %v543_v18 = vld [vmem:[%s534_s19 + $0x40] sm:$0xff]  ;;  %s527_s19 = sand.u32 1, %s2148_s22  }
  0x42   : > { %1906 = vmatprep.subr.bf16.mxu0 %v1905_v4  ;;  %v1917_v14 = vpack.c.bf16 %v542_v12, %v541_v11  ;;  %602 = vperm.xlu0 %2052, %v566_v19   ;;  %v551_v33 = vld [vmem:[#allocation2 + $0x38] sm:$0xff]  ;;  %v574_v34 = vld [vmem:[%s2665_s3 + $0x60] sm:$0xff]  ;;  %v575_v36 = vld [vmem:[%s2665_s3 + $0x68] sm:$0xff]  ;;  %s1696_s29 = sshll.u32 %s527_s19, 4  ;;  %s2621_s23 = scalar_lea.sflag [#allocation4], %s527_s19 }
  0x43   : > { %1908 = vmatpush3.bf16.msra.mxu0 %v1905_v4  ;;  %607 = vperm.xlu1 %2053, %v567_v20   ;;  %v552_v35 = vld [vmem:[#allocation2 + $0x40] sm:$0xff]  ;;  %v553_v37 = vld [vmem:[#allocation2 + $0x48] sm:$0xff]  ;;  %v576_v38 = vld [vmem:[%s2665_s3 + $0x70] sm:$0xff]  ;;  %s529_s21 = scalar_lea.vmem [#allocation5], %s1696_s29  ;;  %s2096_s29 = scalar_lea.vmem %s2095_s28, 512 }
  0x44   : > { %1910 = vmatprep.subr.bf16.mxu0 %v1909_v6  ;;  %v554_v39 = vld [vmem:[#allocation2 + $0x50] sm:$0xff]  ;;  %v577_v40 = vld [vmem:[%s2665_s3 + $0x78] sm:$0xff]  ;;  %v578_v42 = vld [vmem:[%s2665_s3 + $0x80] sm:$0xff]  ;;  %s1616_s30 = sshll.u32 %s529_s21, 4  ;;  %s2614_s30 = int_to_ptr.vmem [resolvable:$true] %s1616_s30 }
  0x45   : > { %v555_v41 = vld [vmem:[#allocation2 + $0x58] sm:$0xff]  ;;  %v556_v43 = vld [vmem:[#allocation2 + $0x60] sm:$0xff]  ;;  %v579_v44 = vld [vmem:[%s2665_s3 + $0x88] sm:$0xff]  ;;  %s2090_s25 = scalar_lea.vmem %s2614_s30, 256  ;;  %p2097_p2 = scmp.lt.s32.totalorder %s2614_s30, %s2095_s28 }
  0x46   : > { %612 = vperm.xlu0 %2052, %v568_v22   ;;  %v557_v45 = vld [vmem:[#allocation2 + $0x68] sm:$0xff]  ;;  %v938_v46 = vld [vmem:[%s2667_s5] sm:$0xff]  ;;  %v558_v47 = vld [vmem:[#allocation2 + $0x70] sm:$0xff]  ;;  %p2091_p6 = scmp.ne.s32.totalorder %s2614_s30, %s2090_s25  ;;  %p2098_p3 = scmp.lt.s32.totalorder %s2096_s29, %s2090_s25 }
  0x47   : > { %1912 = vmatpush3.bf16.msra.mxu0 %v1909_v6  ;;  %617 = vperm.xlu1 %2053, %v569_v24   ;;  %v939_v48 = vld [vmem:[%s2667_s5 + $0x8] sm:$0xff]  ;;  %v559_v49 = vld [vmem:[#allocation2 + $0x78] sm:$0xff]  ;;  %v1126_v50 = vld [vmem:[%s2669_s7] sm:$0x3] }
  0x48   : > { %1914 = vmatprep.subr.bf16.mxu0 %v1913_v10  ;;  %v560_v51 = vld [vmem:[#allocation2 + $0x80] sm:$0xff]  ;;  %v561_v53 = vld [vmem:[#allocation2 + $0x88] sm:$0xff]  ;;  %v1036_v63 = vld [vmem:[%s2676_s14 + $0x10] sm:$0xff]  ;;  %p2092_p10 = pnand %p2091_p6, %p2701_p9  ;;  %p2099_p4 = por %p2098_p3, %p2097_p2 }
  0x49   : > { %v1208_v52 = vld [vmem:[%s2671_s9] sm:$0xff]  ;;  %v1209_v54 = vld [vmem:[%s2671_s9 + $0x8] sm:$0xff]  ;;  %v1037_v1 = vld [vmem:[%s2676_s14 + $0x18] sm:$0xff] }
  0x4a   : > { %622 = vperm.xlu0 %2052, %v570_v26   ;;  %v1407_v55 = vld [vmem:[%s2675_s13] sm:$0xff]  ;;  %v1408_v56 = vld [vmem:[%s2675_s13 + $0x8] sm:$0xff]  ;;  %v1952_v2 = vpack.c.bf16 %v1037_v1, %v1036_v63  ;;  %v1040_v6 = vld [vmem:[%s2676_s14 + $0x30] sm:$0xff]  ;;  %p2093_p12 = pneg %p2092_p10 }
  0x4b   : > { %1916 = vmatpush3.bf16.msra.mxu0 %v1913_v10  ;;  %627 = vperm.xlu1 %2053, %v571_v28   ;;  %v1503_v57 = vld [vmem:[%s2673_s11] sm:$0xff]  ;;  %v1504_v58 = vld [vmem:[%s2673_s11 + $0x8] sm:$0xff]  ;;  %v1041_v8 = vld [vmem:[%s2676_s14 + $0x38] sm:$0xff] }
  0x4c   : > { %1918 = vmatprep.subr.bf16.mxu0 %v1917_v14  ;;  %v935_v60 = vld [vmem:[%s2666_s4 + $0x8] sm:$0xff]  ;;  %v1034_v61 = vld [vmem:[%s2676_s14] sm:$0xff]  ;;  %v1960_v9 = vpack.c.bf16 %v1041_v8, %v1040_v6  ;;  %v1044_v13 = vld [vmem:[%s2676_s14 + $0x50] sm:$0xff]  ;;  %p2100_p7 = pnand %p2099_p4, %p2093_p12 }
  0x4d   : > { %1716 = vmatprep.mubr.msk.f32.mxu1 %vm950_vm1, %v935_v60  ;;  %v1035_v62 = vld [vmem:[%s2676_s14 + $0x8] sm:$0xff]  ;;  %v1038_v3 = vld [vmem:[%s2676_s14 + $0x20] sm:$0xff]  ;;  %v905_v63 = vld [vmem:[%s2663_s1 + $0x38] sm:$0xff] }
  0x4e   : > { %632 = vperm.xlu0 %2052, %v572_v30   ;;  %v1948_v0 = vpack.c.bf16 %v1035_v62, %v1034_v61  ;;  %v1039_v4 = vld [vmem:[%s2676_s14 + $0x28] sm:$0xff]  ;;  %v1042_v10 = vld [vmem:[%s2676_s14 + $0x40] sm:$0xff] }
  0x4f   : > { %1920 = vmatpush3.bf16.msra.mxu0 %v1917_v14  ;;  %637 = vperm.xlu1 %2053, %v573_v32   ;;  %v1956_v5 = vpack.c.bf16 %v1039_v4, %v1038_v3  ;;  %v1043_v11 = vld [vmem:[%s2676_s14 + $0x48] sm:$0xff]  ;;  %v1045_v14 = vld [vmem:[%s2676_s14 + $0x58] sm:$0xff]  ;;  %v898_v30 = vld [vmem:[%s2663_s1] sm:$0xff] }
  0x50   : > { %1812 = vmatprep.subr.mxu0 %v543_v18  ;;  %v1964_v12 = vpack.c.bf16 %v1043_v11, %v1042_v10  ;;  %v1968_v15 = vpack.c.bf16 %v1045_v14, %v1044_v13  ;;  %v899_v26 = vld [vmem:[%s2663_s1 + $0x8] sm:$0xff]  ;;  %v904_v3 = vld [vmem:[%s2663_s1 + $0x30] sm:$0xff] }
  0x52   : > { %642 = vperm.xlu0 %2052, %v574_v34  }
  0x53   : > { %1813 = vmatpush3.msra.mxu0 %v543_v18  ;;  %647 = vperm.xlu1 %2053, %v575_v36  }
  0x54   : > { %1815 = vmatmul.mubr.msk.f32.vlgmr.msra.gmra.mrb[0].mxu0 %vm670_vm0, %v545_v21  ;;  %1949 = vmatprep.subr.bf16.mxu0 %v1948_v0 }
  0x55   : > { %1817 = vmatprep.mubr.msk.f32.mxu0 %vm670_vm0, %v546_v23  ;;  %1951 = vmatpush3.bf16.msra.mxu0 %v1948_v0 }
  0x56   : > { %652 = vperm.xlu0 %2052, %v576_v38   ;;  %1953 = vmatprep.subr.bf16.mxu0 %v1952_v2 }
  0x57   : > { %657 = vperm.xlu1 %2053, %v577_v40   ;;  %v900_v40 = vld [vmem:[%s2663_s1 + $0x10] sm:$0xff] }
  0x58   : > { %1818 = vmatmul.mubr.msk.f32.gmra.mrb[2].mxu0 %vm670_vm0, %v547_v25 }
  0x59   : > { %1820 = vmatprep.mubr.msk.f32.mxu0 %vm670_vm0, %v548_v27  ;;  %1955 = vmatpush3.bf16.msra.mxu0 %v1952_v2 }
  0x5a   : > { %662 = vperm.xlu0 %2052, %v578_v42   ;;  %1957 = vmatprep.subr.bf16.mxu0 %v1956_v5 }
  0x5b   : > { %667 = vperm.xlu1 %2053, %v579_v44  }
  0x5c   : > { %1821 = vmatmul.mubr.msk.f32.gmra.mrb[4].mxu0 %vm670_vm0, %v549_v29 }
  0x5d   : > { %1823 = vmatprep.mubr.msk.f32.mxu0 %vm670_vm0, %v550_v31  ;;  %1959 = vmatpush3.bf16.msra.mxu0 %v1956_v5 }
  0x5e   : > { %942 = vperm.xlu0 %2052, %v938_v46   ;;  %1961 = vmatprep.subr.bf16.mxu0 %v1960_v9 }
  0x5f   : > { %947 = vperm.xlu1 %2053, %v939_v48  }
  0x60   : > { %1824 = vmatmul.mubr.msk.f32.gmra.mrb[6].mxu0 %vm670_vm0, %v551_v33 }
  0x61   : > { %1826 = vmatprep.mubr.msk.f32.mxu0 %vm670_vm0, %v552_v35  ;;  %1963 = vmatpush3.bf16.msra.mxu0 %v1960_v9 }
  0x62   : > { %1129 = vperm.xlu0 %2052, %v1126_v50   ;;  %1965 = vmatprep.subr.bf16.mxu0 %v1964_v12  ;;  %v903_v50 = vld [vmem:[%s2663_s1 + $0x28] sm:$0xff] }
  0x63   : > { %1212 = vperm.xlu1 %2053, %v1208_v52  }
  0x64   : > { %1827 = vmatmul.mubr.msk.f32.gmra.mrb[8].mxu0 %vm670_vm0, %v553_v37  ;;  %v901_v37 = vld [vmem:[%s2663_s1 + $0x18] sm:$0xff] }
  0x65   : > { %1829 = vmatprep.mubr.msk.f32.mxu0 %vm670_vm0, %v554_v39  ;;  %1967 = vmatpush3.bf16.msra.mxu0 %v1964_v12  ;;  %v907_v12 = vld [vmem:[%s2663_s1 + $0x48] sm:$0xff] }
  0x66   : > { %1217 = vperm.xlu0 %2052, %v1209_v54   ;;  %1969 = vmatprep.subr.bf16.mxu0 %v1968_v15 }
  0x67   : > { %1411 = vperm.xlu1 %2053, %v1407_v55  }
  0x68   : > { %1830 = vmatmul.mubr.msk.f32.gmra.mrb[10].mxu0 %vm670_vm0, %v555_v41 }
  0x69   : > { %1832 = vmatprep.mubr.msk.f32.mxu0 %vm670_vm0, %v556_v43  ;;  %1971 = vmatpush3.bf16.msra.mxu0 %v1968_v15  ;;  %v906_v15 = vld [vmem:[%s2663_s1 + $0x40] sm:$0xff] }
  0x6a   : > { %1416 = vperm.xlu0 %2052, %v1408_v56  }
  0x6b   : > { %1507 = vperm.xlu1 %2053, %v1503_v57  }
  0x6c   : > { %1833 = vmatmul.mubr.msk.f32.gmra.mrb[12].mxu0 %vm670_vm0, %v557_v45 }
  0x6d   : > { %1835 = vmatprep.mubr.msk.f32.mxu0 %vm670_vm0, %v558_v47 }
  0x6e   : > { %1512 = vperm.xlu0 %2052, %v1504_v58  }
  0x70   : > { %1836 = vmatmul.mubr.msk.f32.gmra.mrb[14].mxu0 %vm670_vm0, %v559_v49 }
  0x71   : > { %1838 = vmatprep.mubr.msk.f32.mxu0 %vm670_vm0, %v560_v51 }
  0x74   : > { %1839 = vmatmul.mubr.msk.f32.gmra.mrb[16].mxu0 %vm670_vm0, %v561_v53  ;;  %v902_v53 = vld [vmem:[%s2663_s1 + $0x20] sm:$0xff] }
  0xb9   : > { %v583_v17 = vpop.permute.xlu0 %582 }
  0xba   : > { %v593_v16 = vpop.permute.xlu1 %592 }
  0xbd   : > { %v588_v19 = vpop.permute.xlu0 %587 }
  0xbe   : > { %v598_v18 = vpop.permute.xlu1 %597 }
  0xc1   : > { %v603_v21 = vpop.permute.xlu0 %602 }
  0xc2   : > { %v608_v20 = vpop.permute.xlu1 %607 }
  0xc5   : > { %v613_v28 = vpop.permute.xlu0 %612 }
  0xc6   : > { %v618_v25 = vpop.permute.xlu1 %617 }
  0xc9   : > { %v623_v45 = vpop.permute.xlu0 %622 }
  0xca   : > { %v628_v41 = vpop.permute.xlu1 %627 }
  0xcd   : > { %v633_v1 = vpop.permute.xlu0 %632 }
  0xce   : > { %v638_v61 = vpop.permute.xlu1 %637 }
 0x127   : > { %v1816_v22 = vpop.f32.mrb[0].mxu0 }
 0x128   : > { %v797_v23 = vadd.f32 %v1816_v22, %v588_v19  ;;  %v791_v24 = vpop.f32.mrb[1].mxu0 }
 0x129   : > { %v792_v27 = vadd.f32 %v791_v24, %v583_v17 }
 0x12a   : > { %v881_v29 = vmax.f32 %v797_v23, 0.0 }
 0x12b   : > { %v880_v31 = vmax.f32 %v792_v27, 0.0  ;;  %v1819_v32 = vpop.f32.mrb[2].mxu0 }
 0x12c   : > { %v917_v33 = vmul.f32 %v899_v26, %v881_v29  ;;  %v807_v34 = vadd.f32 %v1819_v32, %v598_v18  ;;  %v801_v35 = vpop.f32.mrb[3].mxu0 }
 0x12d   : > { %v916_v36 = vmul.f32 %v898_v30, %v880_v31  ;;  %v802_v38 = vadd.f32 %v801_v35, %v593_v16  ;;  %v648_v16 = vpop.permute.xlu1 %647 }
 0x12e   : > { %v883_v39 = vmax.f32 %v807_v34, 0.0 }
 0x12f   : > { %v882_v42 = vmax.f32 %v802_v38, 0.0  ;;  %v1822_v43 = vpop.f32.mrb[4].mxu0  ;;  %v1922_v44 = vpack.c.bf16 %v917_v33, %v916_v36 }
 0x130   : > { %v919_v46 = vmul.f32 %v901_v37, %v883_v39  ;;  %v817_v47 = vadd.f32 %v1822_v43, %v608_v20  ;;  %v811_v48 = vpop.f32.mrb[5].mxu0  ;;  %v643_v20 = vpop.permute.xlu0 %642  ;;  %v911_v37 = vld [vmem:[%s2663_s1 + $0x68] sm:$0xff] }
 0x131   : > { %v918_v49 = vmul.f32 %v900_v40, %v882_v42  ;;  %v812_v51 = vadd.f32 %v811_v48, %v603_v21  ;;  %1923 = vmatpush1.bf16.msra.mxu1 %v1922_v44  ;;  %v658_v35 = vpop.permute.xlu1 %657 }
 0x132   : > { %v885_v52 = vmax.f32 %v817_v47, 0.0  ;;  %1924 = vmatprep.subr.bf16.mxu1 %v2162_v59 }
 0x133   : > { %v884_v54 = vmax.f32 %v812_v51, 0.0  ;;  %v1825_v55 = vpop.f32.mrb[6].mxu0  ;;  %v1925_v56 = vpack.c.bf16 %v919_v46, %v918_v49  ;;  %v913_v49 = vld [vmem:[%s2663_s1 + $0x78] sm:$0xff] }
 0x134   : > { %v921_v57 = vmul.f32 %v903_v50, %v885_v52  ;;  %v827_v58 = vadd.f32 %v1825_v55, %v618_v25  ;;  %v821_v60 = vpop.f32.mrb[7].mxu0  ;;  %v909_v25 = vld [vmem:[%s2663_s1 + $0x58] sm:$0xff]  ;;  %v653_v39 = vpop.permute.xlu0 %652  ;;  %v912_v52 = vld [vmem:[%s2663_s1 + $0x70] sm:$0xff] }
 0x135   : > { %v920_v62 = vmul.f32 %v902_v53, %v884_v54  ;;  %v822_v0 = vadd.f32 %v821_v60, %v613_v28  ;;  %1926 = vmatpush1.bf16.msra.mxu1 %v1925_v56  ;;  %v908_v28 = vld [vmem:[%s2663_s1 + $0x50] sm:$0xff]  ;;  %v668_v53 = vpop.permute.xlu1 %667 }
 0x136   : > { %v887_v2 = vmax.f32 %v827_v58, 0.0  ;;  %1927 = vmatprep.subr.bf16.mxu1 %v2162_v59 }
 0x137   : > { %v886_v4 = vmax.f32 %v822_v0, 0.0  ;;  %v1828_v5 = vpop.f32.mrb[8].mxu0  ;;  %v1928_v6 = vpack.c.bf16 %v921_v57, %v920_v62 }
 0x138   : > { %v923_v8 = vmul.f32 %v905_v63, %v887_v2  ;;  %v837_v9 = vadd.f32 %v1828_v5, %v628_v41  ;;  %v831_v10 = vpop.f32.mrb[9].mxu0  ;;  %v910_v41 = vld [vmem:[%s2663_s1 + $0x60] sm:$0xff]  ;;  %v663_v57 = vpop.permute.xlu0 %662  ;;  %v915_v63 = vld [vmem:[%s2663_s1 + $0x88] sm:$0xff] }
 0x139   : > { %v922_v11 = vmul.f32 %v904_v3, %v886_v4  ;;  %v832_v13 = vadd.f32 %v831_v10, %v623_v45  ;;  %1929 = vmatpush1.bf16.msra.mxu1 %v1928_v6  ;;  %v914_v2 = vld [vmem:[%s2663_s1 + $0x80] sm:$0xff]  ;;  %v937_v10 = vld [vmem:[%s2666_s4 + $0x18] sm:$0xff] }
 0x13a   : > { %v889_v14 = vmax.f32 %v837_v9, 0.0  ;;  %1930 = vmatprep.subr.bf16.mxu1 %v2162_v59  ;;  %v934_v9 = vld [vmem:[%s2666_s4] sm:$0xff] }
 0x13b   : > { %v888_v17 = vmax.f32 %v832_v13, 0.0  ;;  %v1831_v18 = vpop.f32.mrb[10].mxu0  ;;  %v1931_v19 = vpack.c.bf16 %v923_v8, %v922_v11  ;;  %v936_v11 = vld [vmem:[%s2666_s4 + $0x10] sm:$0xff]  ;;  %v1047_v13 = vld [vmem:[%s2676_s14 + $0x68] sm:$0xff] }
 0x13c   : > { %v925_v21 = vmul.f32 %v907_v12, %v889_v14  ;;  %v847_v22 = vadd.f32 %v1831_v18, %v638_v61  ;;  %v841_v23 = vpop.f32.mrb[11].mxu0  ;;  %v1046_v12 = vld [vmem:[%s2676_s14 + $0x60] sm:$0xff]  ;;  %v943_v18 = vpop.permute.xlu0 %942 }
 0x13d   : > { %v924_v24 = vmul.f32 %v906_v15, %v888_v17  ;;  %v842_v26 = vadd.f32 %v841_v23, %v633_v1  ;;  %1932 = vmatpush1.bf16.msra.mxu1 %v1931_v19  ;;  %v1972_v14 = vpack.c.bf16 %v1047_v13, %v1046_v12  ;;  %v1048_v15 = vld [vmem:[%s2676_s14 + $0x70] sm:$0xff]  ;;  %v948_v23 = vpop.permute.xlu1 %947 }
 0x13e   : > { %v891_v27 = vmax.f32 %v847_v22, 0.0  ;;  %1933 = vmatprep.subr.bf16.mxu1 %v2162_v59 }
 0x13f   : > { %v890_v29 = vmax.f32 %v842_v26, 0.0  ;;  %v1834_v30 = vpop.f32.mrb[12].mxu0  ;;  %v1934_v31 = vpack.c.bf16 %v925_v21, %v924_v24  ;;  %1973 = vmatprep.subr.bf16.mxu0 %v1972_v14 }
 0x140   : > { %v927_v32 = vmul.f32 %v909_v25, %v891_v27  ;;  %v857_v33 = vadd.f32 %v1834_v30, %v648_v16  ;;  %v851_v34 = vpop.f32.mrb[13].mxu0  ;;  %1975 = vmatpush3.bf16.msra.mxu0 %v1972_v14  ;;  %v1049_v16 = vld [vmem:[%s2676_s14 + $0x78] sm:$0xff] }
 0x141   : > { %v926_v36 = vmul.f32 %v908_v28, %v890_v29  ;;  %v852_v38 = vadd.f32 %v851_v34, %v643_v20  ;;  %1935 = vmatpush1.bf16.msra.mxu1 %v1934_v31  ;;  %v1976_v17 = vpack.c.bf16 %v1049_v16, %v1048_v15  ;;  %v1125_v31 = vld [vmem:[%s2668_s6] sm:$0x3] }
 0x142   : > { %v893_v40 = vmax.f32 %v857_v33, 0.0  ;;  %1936 = vmatprep.subr.bf16.mxu1 %v2162_v59  ;;  %v1130_v33 = vpop.permute.xlu0 %1129 }
 0x143   : > { %v892_v42 = vmax.f32 %v852_v38, 0.0  ;;  %v1837_v43 = vpop.f32.mrb[14].mxu0  ;;  %v1937_v44 = vpack.c.bf16 %v927_v32, %v926_v36  ;;  %1977 = vmatprep.subr.bf16.mxu0 %v1976_v17  ;;  %v1206_v32 = vld [vmem:[%s2670_s8] sm:$0xff]  ;;  %v1207_v38 = vld [vmem:[%s2670_s8 + $0x8] sm:$0xff] }
 0x144   : > { %v929_v45 = vmul.f32 %v911_v37, %v893_v40  ;;  %v867_v46 = vadd.f32 %v1837_v43, %v658_v35  ;;  %v861_v47 = vpop.f32.mrb[15].mxu0  ;;  %1979 = vmatpush3.bf16.msra.mxu0 %v1976_v17 }
 0x145   : > { %v928_v48 = vmul.f32 %v910_v41, %v892_v42  ;;  %v862_v50 = vadd.f32 %v861_v47, %v653_v39  ;;  %1938 = vmatpush1.bf16.msra.mxu1 %v1937_v44  ;;  %1980 = vmatprep.subr.bf16.mxu0 %v2162_v59  ;;  %v1318_v39 = vld [vmem:[%s2677_s15] sm:$0x3]  ;;  %v1213_v42 = vpop.permute.xlu1 %1212 }
 0x146   : > { %v895_v51 = vmax.f32 %v867_v46, 0.0  ;;  %1939 = vmatprep.subr.bf16.mxu1 %v2162_v59  ;;  %v1218_v40 = vpop.permute.xlu0 %1217 }
 0x147   : > { %v894_v54 = vmax.f32 %v862_v50, 0.0  ;;  %v1840_v55 = vpop.f32.mrb[16].mxu0  ;;  %v1940_v56 = vpack.c.bf16 %v929_v45, %v928_v48 }
 0x148   : > { %v931_v58 = vmul.f32 %v913_v49, %v895_v51  ;;  %v877_v60 = vadd.f32 %v1840_v55, %v668_v53  ;;  %v871_v61 = vpop.f32.mrb[17].mxu0 }
 0x149   : > { %v930_v62 = vmul.f32 %v912_v52, %v894_v54  ;;  %v872_v0 = vadd.f32 %v871_v61, %v663_v57  ;;  %1941 = vmatpush1.bf16.msra.mxu1 %v1940_v56  ;;  %v1405_v56 = vld [vmem:[%s2674_s12] sm:$0xff]  ;;  %v1406_v57 = vld [vmem:[%s2674_s12 + $0x8] sm:$0xff] }
 0x14a   : > { %v897_v1 = vmax.f32 %v877_v60, 0.0  ;;  %1942 = vmatprep.subr.bf16.mxu1 %v2162_v59 }
 0x14b   : > { %v896_v3 = vmax.f32 %v872_v0, 0.0  ;;  %v1943_v4 = vpack.c.bf16 %v931_v58, %v930_v62  ;;  %v1501_v58 = vld [vmem:[%s2672_s10] sm:$0xff]  ;;  %v1502_v0 = vld [vmem:[%s2672_s10 + $0x8] sm:$0xff] }
 0x14c   : > { %v933_v5 = vmul.f32 %v915_v63, %v897_v1  ;;  %v1417_v1 = vpop.permute.xlu0 %1416 }
 0x14d   : > { %v932_v6 = vmul.f32 %v914_v2, %v896_v3  ;;  %1944 = vmatpush1.bf16.msra.mxu1 %v1943_v4  ;;  %v1412_v2 = vpop.permute.xlu1 %1411 }
 0x14e   : > { %1945 = vmatprep.subr.bf16.mxu1 %v2162_v59  ;;  %v2164_v59 = vmov 0.0  }
 0x14f   : > { %v1946_v8 = vpack.c.bf16 %v933_v5, %v932_v6 }
 0x150   : > { %v1513_v3 = vpop.permute.xlu0 %1512 }
 0x151   : > { %1947 = vmatpush1.bf16.msra.mxu1 %v1946_v8  ;;  %v1508_v4 = vpop.permute.xlu1 %1507  ;;  %v1987_v5 = vadd.f32 %v1513_v3, %v1417_v1 }
 0x152   : > { %v1989_v6 = vadd.f32 %v1508_v4, %v1412_v2 }
 0x154   : > { %1022 = vmatmul.mubr.f32.vlgmr.msra.gmra.mrb[0].mxu1 %v934_v9 }
 0x155   : > { %1717 = vmatprep.mubr.msk.f32.mxu1 %vm950_vm1, %v937_v10 }
 0x158   : > { %1027 = vmatmul.mubr.f32.gmra.mrb[2].mxu1 %v936_v11 }
 0x159   : > { %1885 = vmatprep.mubr.msk.f32.mxu1 %vm1220_vm3, %v1206_v32 }
 0x227   : > { %v1023_v19 = vpop.f32.mrb[0].mxu1 }
 0x228   : > { %v2569_v20 = vadd.f32 %v1023_v19, %v943_v18  ;;  %v1025_v21 = vpop.f32.mrb[1].mxu1 }
 0x22a   : > { %v1032_v22 = vmax.f32 %v2569_v20, 0.0 }
 0x22b   : > { %v1028_v24 = vpop.f32.mrb[2].mxu1 }
 0x22c   : > { %v2572_v25 = vadd.f32 %v1028_v24, %v948_v23  ;;  %v1030_v26 = vpop.f32.mrb[3].mxu1  ;;  %1873 = vmatprep.mubr.f32.mxu0 %v1032_v22 }
 0x22e   : > { %v1033_v27 = vmax.f32 %v2572_v25, 0.0 }
 0x230   : > { %1874 = vmatmul.mubr.f32.vlgmr.msra.gmra.mrb[18].mxu0 %v1033_v27 }
 0x231   : > { %1880 = vmatprep.mubr.msk.f32.mxu0 %vm2163_vm2, %v2164_v59 }
 0x303   : > { %v1875_v28 = vpop.f32.mrb[18].mxu0 }
 0x304   : > { %v1116_v29 = vpop.f32.mrb[19].mxu0 }
 0x305   : > { %v1981_v30 = vpack.c.bf16 %v1875_v28, %v1116_v29 }
 0x307   : > { %1982 = vmatpush3.bf16.msra.mxu0 %v1981_v30 }
 0x30a   : > { %1881 = vmatmul.mubr.msk.f32.vlgmr.msra.gmra.mrb[20].mxu0 %vm950_vm1, %v1125_v31 }
 0x3dd   : > { %v1201_v34 = vpop.f32.mrb[20].mxu0 }
 0x3de   : > { %v1202_v35 = vadd.f32 %v1201_v34, %v1130_v33  ;;  %v1882_v36 = vpop.f32.mrb[21].mxu0 }
 0x3e0   : > { %v1205_v37 = vmax.f32 %v1202_v35, 0.0 }
 0x3e2   : > { %1883 = vmatprep.subr.msk.mxu1 %vm1227_vm4, %v1205_v37 }
 0x3e3   : > { %1884 = vmatpush3.msk.msra.mxu1 %vm1227_vm4, %v1205_v37 }
 0x3e4   : > { %1886 = vmatmul.mubr.msk.f32.vlgmr.msra.gmra.mrb[4].mxu1 %vm1220_vm3, %v1207_v38  ;;  %1888 = vmatprep.subr.msk.mxu1 %vm1227_vm4, %v1318_v39 }
 0x3e5   : > { %1889 = vmatpush3.msk.msra.mxu1 %vm1227_vm4, %v1318_v39 }
 0x3e6   : > { %1893 = vmatprep.subr.mxu1 %v2341_v7 }
 0x4b7   : > { %v1887_v41 = vpop.f32.mrb[4].mxu1 }
 0x4b8   : > { %v1303_v43 = vadd.f32 %v1887_v41, %v1218_v40  ;;  %v1297_v44 = vpop.f32.mrb[5].mxu1 }
 0x4b9   : > { %v1298_v45 = vadd.f32 %v1297_v44, %v1213_v42 }
 0x4ba   : > { %v1307_v46 = vsub.f32 0.0, %v1303_v43 }
 0x4bb   : > { %v1306_v47 = vsub.f32 0.0, %v1298_v45 }
 0x4bc   : > { %v1310_v48 = vmul.f32 1.442695, %v1307_v46 }
 0x4bd   : > { %v1308_v49 = vmul.f32 1.442695, %v1306_v47 }
 0x4be   : > { %2054 = vpow2.f32 %v1310_v48 }
 0x4bf   : > { %2056 = vpow2.f32 %v1308_v49 }
 0x4c8   : > { %v2055_v50 = vpop.eup %2054 }
 0x4c9   : > { %v2057_v51 = vpop.eup %2056  ;;  %v1313_v52 = vadd.f32 1.0, %v2055_v50 }
 0x4ca   : > { %v1312_v53 = vadd.f32 1.0, %v2057_v51 }
 0x4cc   : > { %2058 = vrcp.f32 %v1312_v53 }
 0x4cd   : > { %2060 = vrcp.f32 %v1313_v52 }
 0x4d6   : > { %v2059_v54 = vpop.eup %2058 }
 0x4d7   : > { %v2061_v55 = vpop.eup %2060  ;;  %1890 = vmatprep.mubr.msk.f32.mxu1 %vm1220_vm3, %v2059_v54 }
 0x4d8   : > { %1891 = vmatmul.mubr.msk.f32.vlgmr.msra.gmra.mrb[6].mxu1 %vm1220_vm3, %v2061_v55 }
 0x4d9   : > { %1894 = vmatpush3.msra.mxu1 %v2341_v7  ;;  %1895 = vmatprep.mubr.msk.f32.mxu1 %vm1419_vm5, %v1405_v56 }
 0x4dc   : > { %1896 = vmatmul.mubr.msk.f32.vlgmr.msra.gmra.mrb[8].mxu1 %vm1419_vm5, %v1406_v57 }
 0x4dd   : > { %1902 = vmatprep.mubr.msk.f32.mxu1 %vm950_vm1, %v1501_v58 }
 0x5ab   : > { %v1892_v60 = vpop.f32.mrb[6].mxu1 }
 0x5ac   : > { %v1404_v7 = vmul.f32 %v1892_v60, %v1033_v27  ;;  %v1394_v61 = vpop.f32.mrb[7].mxu1 }
 0x5ad   : > { %v1403_v62 = vmul.f32 %v1394_v61, %v1032_v22 }
 0x5af   : > { %v1983_v63 = vpack.c.bf16 %v1404_v7, %v1403_v62 }
 0x5b1   : > { %1984 = vmatprep.subr.bf16.mxu1 %v1983_v63 }
 0x5b2   : > { %1986 = vmatpush3.bf16.msra.mxu1 %v1983_v63 }
 0x5b5   : > { %1903 = vmatmul.mubr.msk.f32.vlgmr.msra.gmra.mrb[8].mxu1 %vm950_vm1, %v1502_v0 }
 0x688   : > { %v1904_v8 = vpop.f32.mrb[8].mxu1 }
 0x689   : > { %v1988_v9 = vadd.f32 %v1987_v5, %v1904_v8  ;;  %v1587_v10 = vpop.f32.mrb[9].mxu1 }
 0x68a   : > { %v1990_v11 = vadd.f32 %v1989_v6, %v1587_v10 }
 0x68b   : > { %v1599_v12 = vmax.f32 %v1988_v9, 0.0 }
 0x68c   : > { %v1598_v13 = vmax.f32 %v1990_v11, 0.0 }
 0x68d   : > { %1601 = vst [vmem:[%s529_s21 + $0x8] sm:$0xff] %v1599_v12 }
 0x68e   : > { %1600 = vst [vmem:[%s529_s21] sm:$0xff] %v1598_v13 }
 0x68f   : > { %2103 = shalt.err (!%p2100_p7)
}
 0x690   : > { %s2104_s19 = scalar_lea.hbm %s2619_s18, 256  ;;  %s2108_s26 = scalar_lea.hbm %s2678_s16, 512 }
 0x691   : > { %p2105_p8 = scmp.ne.s32.totalorder %s2619_s18, %s2104_s19  ;;  %p2109_p1 = scmp.lt.u32.totalorder %s2619_s18, %s2678_s16 }
 0x692   : > { %p2110_p0 = scmp.lt.u32.totalorder %s2108_s26, %s2104_s19  ;;  %p2112_p6 = scmp.lt.u32.totalorder %s2104_s19, %s2619_s18 }
 0x693   : > { %p2106_p11 = pnand %p2105_p8, %p2701_p9 }
 0x694   : > { %p2111_p5 = por %p2110_p0, %p2109_p1 }
 0x695   : > { %p2107_p13 = pneg %p2106_p11 }
 0x696   : > { %p2113_p10 = por %p2112_p6, %p2111_p5 }
 0x698   : > { %p2114_p12 = pnand %p2113_p10, %p2107_p13 }
 0x69a   : > { %2117 = shalt.err (!%p2114_p12)
}
 0x69b   : > { %s2166_s25 = smov 128   ;;  %s2167_s28 = smov 8  }
 0x69c   : > { %1998 = dma.vmem_to_hbm [thread:$0]  (%p2701_p9), %s2614_s30, 256, %s2619_s18, %s2621_s23, %s2166_s25, %s2166_s25, %s2167_s28  }
 0x69d PF: > { %s2702_s29 = sld [smem:[#allocation8_spill]]  ;;  %s2703_s21 = sld [smem:[#allocation12_spill]] }
 0x69e   : > { %p2010_p2 = scmp.ge.s32.totalorder %s2156_s24, 2 }
 0x6a3   : > { %s1631_s17 = sand.u32 1, %s2702_s29   ;;  %p2704_p3 = scmp.ne.s32.totalorder %s2703_s21, 0 }
 0x6a4   : > { %s1632_s19 = scalar_lea.sflag [#allocation4], %s1631_s17 }
 0x6a5   : > { %p2005_p4 = pnand %p2010_p2, %p2704_p3 }
 0x6a7   : > { %2139 = dma.done.wait (!%p2005_p4), %s1632_s19, 256  }
 0x6a8   : > { %2141 = vsyncadd (!%p2005_p4), %s1632_s19, 4294967040  ;;  %s2705_s24 = sld [smem:[#allocation10_spill]]  ;;  %s2706_s26 = sld [smem:[#allocation9_spill]] }
 0x6a9   : > { %s2707_s23 = sld [smem:[#allocation11_spill]]  ;;  %s2708_s21 = smov %s2148_s22 }
 0x6ae   : > { %p27_p7 = scmp.ge.s32.totalorder %s2705_s24, 4   ;;  %s2709_s22 = smov %s2706_s26 }
 0x6b0   :  { %29 = sbr.rel (!%p27_p7) target bundleno = 6 (0x6), region = 124 }
 0x6b7   :  { %1637 = vsyncpa [#allocation3], 1 }
 0x6b8   :  { %1639 = vsyncpa [#allocation3 + $0x1], 1 }
 0x6b9   :  { %1640 = vsyncpa [#allocation4], 1 }
 0x6ba   :  { %1642 = vsyncpa [#allocation4 + $0x1], 1 }

</bundles_post_ra>
